<compile_context>
chip_gen: v7x
topology: tpu7x:2x2x1
jax: 0.10.0
libtpu: 0.0.40
codegen_flags: <defaults>
</compile_context>

<pallas_src>
import functools

import jax
import jax.numpy as jnp
from jax.experimental import pallas as pl
from jax.experimental.pallas import tpu as pltpu

EPS = 1e-5
_LANE = 128


def _domain_disc_kernel(x_ref, p_ref, o_ref, *,
                        in_feature, hidden, b_valid, b_pad, use_bf16):
    IN, H = in_feature, hidden
    inv_b = 1.0 / float(b_valid)                 # static python float
    mm_dtype = jnp.bfloat16 if use_bf16 else jnp.float32
    need_mask = (b_valid != b_pad)               # static -> branch folds away

    if need_mask:
        row = jax.lax.broadcasted_iota(jnp.int32, (b_pad, 1), 0)
        mask = (row < b_valid).astype(jnp.float32)          # (B_pad, 1)

    # ---- static views into the packed parameter slab (free) ----
    w1 = p_ref[0:IN, :]                                      # (IN, H)
    w2 = p_ref[IN:IN + H, :]                                 # (H,  H)
    v0 = IN + H
    g1, be1 = p_ref[v0 + 0:v0 + 1, :], p_ref[v0 + 1:v0 + 2, :]
    g2, be2 = p_ref[v0 + 2:v0 + 3, :], p_ref[v0 + 3:v0 + 4, :]
    w3 = p_ref[v0 + 4:v0 + 5, :]                             # (1, H)
    b3 = p_ref[v0 + 5:v0 + 6, 0:1]                           # (1, 1)

    def bn_relu(h, g, be):
        # Training-mode BN over the *valid* batch rows (padded rows of h are
        # exactly 0 because the linear layers carry no bias here).
        mu = jnp.sum(h, axis=0, keepdims=True) * inv_b       # (1, H)
        d = h - mu
        if need_mask:
            dm = d * mask                                    # zero padded rows
            var = jnp.sum(dm * d, axis=0, keepdims=True) * inv_b   # two-pass
            s = g * jax.lax.rsqrt(var + EPS)
            a = (dm * s + be) * mask                         # keep pads at 0
        else:
            var = jnp.sum(d * d, axis=0, keepdims=True) * inv_b    # two-pass
            s = g * jax.lax.rsqrt(var + EPS)
            a = d * s + be
        return jnp.maximum(a, 0.0)

    x = x_ref[...]

    # ---- Linear 1 (bias cancelled by batch-stat BN) + BN + ReLU ----
    h = jnp.dot(x.astype(mm_dtype), w1.astype(mm_dtype),
                preferred_element_type=jnp.float32)
    h = bn_relu(h, g1, be1)

    # ---- Linear 2 (bias cancelled) + BN + ReLU ----
    h = jnp.dot(h.astype(mm_dtype), w2.astype(mm_dtype),
                preferred_element_type=jnp.float32)
    h = bn_relu(h, g2, be2)

    # ---- Linear 3 (H -> 1): VPU multiply + lane reduction, off the MXU ----
    logit = jnp.sum(h * w3, axis=-1)[None, :] + b3           # (1, B_pad)
    # sigmoid(x) == 0.5 * (tanh(x/2) + 1): one EUP tanh + FMA, no divide.
    o_ref[...] = 0.5 * (jnp.tanh(0.5 * logit) + 1.0)


def pack_params(p):
    """Collapse ALL parameters into one ((in+H+6), H) slab: a single DMA."""
    H = p["w1"].shape[1]
    return jnp.concatenate(
        [p["w1"],
         p["w2"],
         p["g1"], p["be1"], p["g2"], p["be2"],
         p["w3"].reshape(1, H),
         jnp.broadcast_to(p["b3"].reshape(1, 1), (1, H))],
        axis=0).astype(jnp.float32)


def domain_discriminator(x, packed, *, use_bf16=False):
    """x: (B, in_feature) f32; packed: (in_feature + H + 6, H) f32."""
    B, IN = x.shape
    H = packed.shape[1]
    assert packed.shape[0] == IN + H + 6

    # Pad batch to a lane multiple so the (1, B_pad) store is unmasked.
    b_pad = ((B + _LANE - 1) // _LANE) * _LANE
    if b_pad != B:
        x = jnp.pad(x, ((0, b_pad - B), (0, 0)))

    kernel = functools.partial(
        _domain_disc_kernel, in_feature=IN, hidden=H,
        b_valid=B, b_pad=b_pad, use_bf16=use_bf16)

    vmem = pl.BlockSpec(memory_space=pltpu.MemorySpace.VMEM)
    out = pl.pallas_call(
        kernel,
        out_shape=jax.ShapeDtypeStruct((1, b_pad), jnp.float32),  # lane-dense
        in_specs=[vmem, vmem],
        out_specs=vmem,
        # Explicit scoped-VMEM budget (raises v5e's 16 MiB default; safely
        # below v7x's 64 MiB physical VMEM).
        compiler_params=pltpu.CompilerParams(vmem_limit_bytes=32 * 1024 * 1024),
    )(x, packed)
    return out[0, :B].reshape(B, 1)                           # PyTorch shape


def init_params(key, in_feature, hidden_size):
    """Deterministic synthetic parameters (PyTorch-like init, transposed)."""
    ks = jax.random.split(key, 6)

    def lin(kw, kb, fan_in, fan_out):
        bound = 1.0 / jnp.sqrt(fan_in)
        w = jax.random.uniform(kw, (fan_in, fan_out), jnp.float32, -bound, bound)
        b = jax.random.uniform(kb, (1, fan_out), jnp.float32, -bound, bound)
        return w, b

    w1, b1 = lin(ks[0], ks[1], in_feature, hidden_size)
    w2, b2 = lin(ks[2], ks[3], hidden_size, hidden_size)
    w3, b3 = lin(ks[4], ks[5], hidden_size, 1)
    return {
        "w1": w1, "b1": b1,
        "g1": jnp.ones((1, hidden_size), jnp.float32),
        "be1": jnp.zeros((1, hidden_size), jnp.float32),
        "w2": w2, "b2": b2,
        "g2": jnp.ones((1, hidden_size), jnp.float32),
        "be2": jnp.zeros((1, hidden_size), jnp.float32),
        "w3": w3, "b3": b3,
    }


def _reference(x, p):
    """Pure-JAX reference of the PyTorch forward (training-mode BN, with biases)."""
    def bn(h, g, be):
        mu = jnp.mean(h, axis=0, keepdims=True)
        var = jnp.mean((h - mu) ** 2, axis=0, keepdims=True)
        return (h - mu) / jnp.sqrt(var + EPS) * g + be

    h = jnp.maximum(bn(x @ p["w1"] + p["b1"], p["g1"], p["be1"]), 0.0)
    h = jnp.maximum(bn(h @ p["w2"] + p["b2"], p["g2"], p["be2"]), 0.0)
    return jax.nn.sigmoid(h @ p["w3"] + p["b3"])


if __name__ == "__main__":
    in_feature, hidden_size, batch = 32, 32, 8
    key = jax.random.PRNGKey(0)
    kx, kp = jax.random.split(key)
    x = jax.random.normal(kx, (batch, in_feature), jnp.float32)
    params = init_params(kp, in_feature, hidden_size)
    packed = pack_params(params)                 # pack once, outside hot path
    ref = _reference(x, params)                  # includes b1/b2 (BN cancels them)

    # f32 path: exact check against the reference.
    out = jax.block_until_ready(domain_discriminator(x, packed))
    assert out.shape == (batch, 1)
    assert jnp.allclose(out, ref, atol=1e-5, rtol=1e-5), (out, ref)

    # bf16-MXU path (f32 accumulation + f32 BN/sigmoid): looser smoke check.
    out_bf16 = jax.block_until_ready(domain_discriminator(x, packed, use_bf16=True))
    assert out_bf16.shape == (batch, 1)
    assert jnp.allclose(out_bf16, ref, atol=2e-2, rtol=2e-2), (out_bf16, ref)

    print("KERNEL_OK")
</pallas_src>

<mosaic_0001>
module attributes {stable_mosaic.version = 11 : i64} {
  func.func @_domain_disc_kernel(%arg0: memref<128x32xf32, #tpu.memory_space<vmem>>, %arg1: memref<70x32xf32, #tpu.memory_space<vmem>>, %arg2: memref<1x128xf32, #tpu.memory_space<vmem>>) attributes {dimension_semantics = [], scalar_prefetch = 0 : i64, scratch_operands = 0 : i64, tpu.core_type = #tpu.core_type<tc>} {
    %0 = tpu.iota {dimensions = array<i32: 0>} : vector<128x1xi32>
    %c8_i32 = arith.constant 8 : i32
    %1 = vector.broadcast %c8_i32 : i32 to vector<128x1xi32>
    %2 = arith.cmpi slt, %0, %1 : vector<128x1xi32>
    %3 = arith.extui %2 : vector<128x1xi1> to vector<128x1xi32>
    %4 = arith.sitofp %3 : vector<128x1xi32> to vector<128x1xf32>
    %c0 = arith.constant 0 : index
    %c0_0 = arith.constant 0 : index
    %5 = vector.load %arg1[%c0, %c0_0] : memref<70x32xf32, #tpu.memory_space<vmem>>, vector<32x32xf32>
    %c32 = arith.constant 32 : index
    %c0_1 = arith.constant 0 : index
    %6 = vector.load %arg1[%c32, %c0_1] : memref<70x32xf32, #tpu.memory_space<vmem>>, vector<32x32xf32>
    %c64 = arith.constant 64 : index
    %c0_2 = arith.constant 0 : index
    %7 = vector.load %arg1[%c64, %c0_2] : memref<70x32xf32, #tpu.memory_space<vmem>>, vector<1x32xf32>
    %c65 = arith.constant 65 : index
    %c0_3 = arith.constant 0 : index
    %8 = vector.load %arg1[%c65, %c0_3] : memref<70x32xf32, #tpu.memory_space<vmem>>, vector<1x32xf32>
    %c66 = arith.constant 66 : index
    %c0_4 = arith.constant 0 : index
    %9 = vector.load %arg1[%c66, %c0_4] : memref<70x32xf32, #tpu.memory_space<vmem>>, vector<1x32xf32>
    %c67 = arith.constant 67 : index
    %c0_5 = arith.constant 0 : index
    %10 = vector.load %arg1[%c67, %c0_5] : memref<70x32xf32, #tpu.memory_space<vmem>>, vector<1x32xf32>
    %c68 = arith.constant 68 : index
    %c0_6 = arith.constant 0 : index
    %11 = vector.load %arg1[%c68, %c0_6] : memref<70x32xf32, #tpu.memory_space<vmem>>, vector<1x32xf32>
    %c69 = arith.constant 69 : index
    %c0_7 = arith.constant 0 : index
    %12 = vector.load %arg1[%c69, %c0_7] : memref<70x32xf32, #tpu.memory_space<vmem>>, vector<1x1xf32>
    %c0_8 = arith.constant 0 : index
    %c0_9 = arith.constant 0 : index
    %13 = vector.load %arg0[%c0_8, %c0_9] : memref<128x32xf32, #tpu.memory_space<vmem>>, vector<128x32xf32>
    %cst = arith.constant dense<0.000000e+00> : vector<128x32xf32>
    %14 = tpu.matmul %13, %5, %cst {dimension_numbers = #tpu.dot_dimension_numbers<[1], [0], [0], [1], [0, 0, 1, 1], [], []>} : vector<128x32xf32>, vector<32x32xf32>, vector<128x32xf32> -> vector<128x32xf32>
    %cst_10 = arith.constant dense<0.000000e+00> : vector<32xf32>
    %15 = vector.multi_reduction <add>, %14, %cst_10 [0] : vector<128x32xf32> to vector<32xf32>
    %16 = vector.shape_cast %15 : vector<32xf32> to vector<1x32xf32>
    %cst_11 = arith.constant 1.250000e-01 : f32
    %17 = vector.broadcast %cst_11 : f32 to vector<1x32xf32>
    %18 = arith.mulf %16, %17 : vector<1x32xf32>
    %19 = vector.broadcast %18 : vector<1x32xf32> to vector<128x32xf32>
    %20 = arith.subf %14, %19 : vector<128x32xf32>
    %21 = vector.broadcast %4 : vector<128x1xf32> to vector<128x32xf32>
    %22 = arith.mulf %20, %21 : vector<128x32xf32>
    %23 = arith.mulf %22, %20 : vector<128x32xf32>
    %cst_12 = arith.constant dense<0.000000e+00> : vector<32xf32>
    %24 = vector.multi_reduction <add>, %23, %cst_12 [0] : vector<128x32xf32> to vector<32xf32>
    %25 = vector.shape_cast %24 : vector<32xf32> to vector<1x32xf32>
    %cst_13 = arith.constant 1.250000e-01 : f32
    %26 = vector.broadcast %cst_13 : f32 to vector<1x32xf32>
    %27 = arith.mulf %25, %26 : vector<1x32xf32>
    %cst_14 = arith.constant 9.99999974E-6 : f32
    %28 = vector.broadcast %cst_14 : f32 to vector<1x32xf32>
    %29 = arith.addf %27, %28 : vector<1x32xf32>
    %30 = math.rsqrt %29 : vector<1x32xf32>
    %31 = arith.mulf %7, %30 : vector<1x32xf32>
    %32 = vector.broadcast %31 : vector<1x32xf32> to vector<128x32xf32>
    %33 = arith.mulf %22, %32 : vector<128x32xf32>
    %34 = vector.broadcast %8 : vector<1x32xf32> to vector<128x32xf32>
    %35 = arith.addf %33, %34 : vector<128x32xf32>
    %36 = vector.broadcast %4 : vector<128x1xf32> to vector<128x32xf32>
    %37 = arith.mulf %35, %36 : vector<128x32xf32>
    %cst_15 = arith.constant 0.000000e+00 : f32
    %38 = vector.broadcast %cst_15 : f32 to vector<128x32xf32>
    %39 = arith.maximumf %37, %38 : vector<128x32xf32>
    %cst_16 = arith.constant dense<0.000000e+00> : vector<128x32xf32>
    %40 = tpu.matmul %39, %6, %cst_16 {dimension_numbers = #tpu.dot_dimension_numbers<[1], [0], [0], [1], [0, 0, 1, 1], [], []>} : vector<128x32xf32>, vector<32x32xf32>, vector<128x32xf32> -> vector<128x32xf32>
    %cst_17 = arith.constant dense<0.000000e+00> : vector<32xf32>
    %41 = vector.multi_reduction <add>, %40, %cst_17 [0] : vector<128x32xf32> to vector<32xf32>
    %42 = vector.shape_cast %41 : vector<32xf32> to vector<1x32xf32>
    %cst_18 = arith.constant 1.250000e-01 : f32
    %43 = vector.broadcast %cst_18 : f32 to vector<1x32xf32>
    %44 = arith.mulf %42, %43 : vector<1x32xf32>
    %45 = vector.broadcast %44 : vector<1x32xf32> to vector<128x32xf32>
    %46 = arith.subf %40, %45 : vector<128x32xf32>
    %47 = vector.broadcast %4 : vector<128x1xf32> to vector<128x32xf32>
    %48 = arith.mulf %46, %47 : vector<128x32xf32>
    %49 = arith.mulf %48, %46 : vector<128x32xf32>
    %cst_19 = arith.constant dense<0.000000e+00> : vector<32xf32>
    %50 = vector.multi_reduction <add>, %49, %cst_19 [0] : vector<128x32xf32> to vector<32xf32>
    %51 = vector.shape_cast %50 : vector<32xf32> to vector<1x32xf32>
    %cst_20 = arith.constant 1.250000e-01 : f32
    %52 = vector.broadcast %cst_20 : f32 to vector<1x32xf32>
    %53 = arith.mulf %51, %52 : vector<1x32xf32>
    %cst_21 = arith.constant 9.99999974E-6 : f32
    %54 = vector.broadcast %cst_21 : f32 to vector<1x32xf32>
    %55 = arith.addf %53, %54 : vector<1x32xf32>
    %56 = math.rsqrt %55 : vector<1x32xf32>
    %57 = arith.mulf %9, %56 : vector<1x32xf32>
    %58 = vector.broadcast %57 : vector<1x32xf32> to vector<128x32xf32>
    %59 = arith.mulf %48, %58 : vector<128x32xf32>
    %60 = vector.broadcast %10 : vector<1x32xf32> to vector<128x32xf32>
    %61 = arith.addf %59, %60 : vector<128x32xf32>
    %62 = vector.broadcast %4 : vector<128x1xf32> to vector<128x32xf32>
    %63 = arith.mulf %61, %62 : vector<128x32xf32>
    %cst_22 = arith.constant 0.000000e+00 : f32
    %64 = vector.broadcast %cst_22 : f32 to vector<128x32xf32>
    %65 = arith.maximumf %63, %64 : vector<128x32xf32>
    %66 = vector.broadcast %11 : vector<1x32xf32> to vector<128x32xf32>
    %67 = arith.mulf %65, %66 : vector<128x32xf32>
    %cst_23 = arith.constant dense<0.000000e+00> : vector<128xf32>
    %68 = vector.multi_reduction <add>, %67, %cst_23 [1] : vector<128x32xf32> to vector<128xf32>
    %69 = vector.shape_cast %68 : vector<128xf32> to vector<1x128xf32>
    %70 = vector.broadcast %12 : vector<1x1xf32> to vector<1x128xf32>
    %71 = arith.addf %69, %70 : vector<1x128xf32>
    %cst_24 = arith.constant 5.000000e-01 : f32
    %72 = vector.broadcast %cst_24 : f32 to vector<1x128xf32>
    %73 = arith.mulf %72, %71 : vector<1x128xf32>
    %74 = math.tanh %73 : vector<1x128xf32>
    %cst_25 = arith.constant 1.000000e+00 : f32
    %75 = vector.broadcast %cst_25 : f32 to vector<1x128xf32>
    %76 = arith.addf %74, %75 : vector<1x128xf32>
    %cst_26 = arith.constant 5.000000e-01 : f32
    %77 = vector.broadcast %cst_26 : f32 to vector<1x128xf32>
    %78 = arith.mulf %77, %76 : vector<1x128xf32>
    %c0_27 = arith.constant 0 : index
    %c0_28 = arith.constant 0 : index
    %79 = vector.load %arg2[%c0_27, %c0_28] : memref<1x128xf32, #tpu.memory_space<vmem>>, vector<1x128xf32>
    tpu.vector_store %arg2[%c0_27, %c0_28], %78 {strides = array<i32>} : memref<1x128xf32, #tpu.memory_space<vmem>>, vector<1x128xf32>,
    return
  }
}

</mosaic_0001>

<bundles_post_ra>
// kernel: tpu_custom_call.1
= control target key start
LH: loop header
LB: loop body
LE: loop exit
PB: predicated region body
PF: predicated region fallthrough
CT: control target
= control target key end

     0   :  { %vm107_vm0 = vcmask 261120   ;;  %s1949_s0 = inlined_call_operand.vmem [shape: f32[128,32], index: 0, kind: input, shape index: {}]   ;;  %s1950_s1 = inlined_call_operand.vmem [shape: f32[70,32], index: 1, kind: input, shape index: {}]   ;;  %s1951_s2 = inlined_call_operand.hbm [shape: f32[1,128], index: 2, kind: output, shape index: {}]  }
   0x1   :  { %v77_v0 = vld [vmem:[%s1950_s1] sm:$0xff]  ;;  %v78_v1 = vld [vmem:[%s1950_s1 + $0x8] sm:$0xff]  ;;  %v79_v2 = vld [vmem:[%s1950_s1 + $0x10] sm:$0xff] }
   0x2   :  { %v1379_v3 = vpack.c.bf16 %v78_v1, %v77_v0  ;;  %v80_v4 = vld [vmem:[%s1950_s1 + $0x18] sm:$0xff]  ;;  %v91_v5 = vld [vmem:[%s1949_s0] sm:$0xff] }
   0x3   :  { %v1383_v6 = vpack.c.bf16 %v80_v4, %v79_v2  ;;  %1323 = vmatprep.mubr.msk.f32.mxu0 %vm107_vm0, %v91_v5 }
   0x4   :  { %1380 = vmatprep.subr.bf16.mxu0 %v1379_v3 }
   0x5   :  { %1382 = vmatpush3.bf16.msra.mxu0 %v1379_v3 }
   0x6   :  { %1384 = vmatprep.subr.bf16.mxu0 %v1383_v6 }
   0x7   :  { %7 = vsyncpa [#allocation3], 0  ;;  %v92_v7 = vld [vmem:[%s1949_s0 + $0x8] sm:$0xff]  ;;  %v93_v8 = vld [vmem:[%s1949_s0 + $0x10] sm:$0xff]  ;;  %vm1124_vm1 = vcmask 130112   ;;  %vm1131_vm2 = vcmask 195712  }
   0x8   :  { %v94_v9 = vld [vmem:[%s1949_s0 + $0x18] sm:$0xff]  ;;  %v95_v10 = vld [vmem:[%s1949_s0 + $0x20] sm:$0xff]  ;;  %v96_v11 = vld [vmem:[%s1949_s0 + $0x28] sm:$0xff]  ;;  %vm1138_vm3 = vcmask 261312   ;;  %vm1145_vm4 = vcmask 326912   ;;  %vm1152_vm5 = vcmask 392512  }
   0x9   :  { %1386 = vmatpush3.bf16.msra.mxu0 %v1383_v6  ;;  %v97_v12 = vld [vmem:[%s1949_s0 + $0x30] sm:$0xff]  ;;  %v98_v13 = vld [vmem:[%s1949_s0 + $0x38] sm:$0xff]  ;;  %v99_v14 = vld [vmem:[%s1949_s0 + $0x40] sm:$0xff]  ;;  %vm1159_vm6 = vcmask 458112   ;;  %vm1166_vm7 = vcmask 523712   ;;  %vm1173_vm8 = vcmask 589312  }
   0xa   :  { %v100_v15 = vld [vmem:[%s1949_s0 + $0x48] sm:$0xff]  ;;  %v101_v16 = vld [vmem:[%s1949_s0 + $0x50] sm:$0xff]  ;;  %v102_v17 = vld [vmem:[%s1949_s0 + $0x58] sm:$0xff]  ;;  %vm1180_vm9 = vcmask 654912   ;;  %vm1187_vm10 = vcmask 720512   ;;  %vm1194_vm11 = vcmask 786112  }
   0xb   :  { %v103_v18 = vld [vmem:[%s1949_s0 + $0x60] sm:$0xff]  ;;  %v104_v19 = vld [vmem:[%s1949_s0 + $0x68] sm:$0xff]  ;;  %v105_v20 = vld [vmem:[%s1949_s0 + $0x70] sm:$0xff]  ;;  %vm1201_vm12 = vcmask 851712   ;;  %vm1208_vm13 = vcmask 917312   ;;  %vm1215_vm14 = vcmask 982912  }
   0xc   :  { %1324 = vmatmul.mubr.msk.f32.vlgmr.msra.gmra.mrb[0].mxu0 %vm107_vm0, %v92_v7  ;;  %v106_v21 = vld [vmem:[%s1949_s0 + $0x78] sm:$0xff]  ;;  %v81_v22 = vld [vmem:[%s1950_s1 + $0x20] sm:$0xff]  ;;  %v82_v23 = vld [vmem:[%s1950_s1 + $0x28] sm:$0xff]  ;;  %vm1222_vm15 = vcmask 1048512  }
   0xd   :  { %1326 = vmatprep.mubr.msk.f32.mxu0 %vm107_vm0, %v93_v8  ;;  %v1387_v24 = vpack.c.bf16 %v82_v23, %v81_v22  ;;  %v83_v25 = vld [vmem:[%s1950_s1 + $0x30] sm:$0xff]  ;;  %v84_v26 = vld [vmem:[%s1950_s1 + $0x38] sm:$0xff] }
   0xe   :  { %v1391_v28 = vpack.c.bf16 %v84_v26, %v83_v25 }
   0xf   :  { %1388 = vmatprep.subr.bf16.mxu1 %v1387_v24 }
  0x10   :  { %1327 = vmatmul.mubr.msk.f32.gmra.mrb[2].mxu0 %vm107_vm0, %v94_v9  ;;  %1390 = vmatpush3.bf16.msra.mxu1 %v1387_v24 }
  0x11   :  { %1329 = vmatprep.mubr.msk.f32.mxu0 %vm107_vm0, %v95_v10  ;;  %1392 = vmatprep.subr.bf16.mxu1 %v1391_v28 }
  0x14   :  { %1330 = vmatmul.mubr.msk.f32.gmra.mrb[4].mxu0 %vm107_vm0, %v96_v11  ;;  %1394 = vmatpush3.bf16.msra.mxu1 %v1391_v28 }
  0x15   :  { %1332 = vmatprep.mubr.msk.f32.mxu0 %vm107_vm0, %v97_v12 }
  0x18   :  { %1333 = vmatmul.mubr.msk.f32.gmra.mrb[6].mxu0 %vm107_vm0, %v98_v13 }
  0x19   :  { %1335 = vmatprep.mubr.msk.f32.mxu0 %vm107_vm0, %v99_v14 }
  0x1c   :  { %1336 = vmatmul.mubr.msk.f32.gmra.mrb[8].mxu0 %vm107_vm0, %v100_v15 }
  0x1d   :  { %1338 = vmatprep.mubr.msk.f32.mxu0 %vm107_vm0, %v101_v16 }
  0x20   :  { %1339 = vmatmul.mubr.msk.f32.gmra.mrb[10].mxu0 %vm107_vm0, %v102_v17 }
  0x21   :  { %1341 = vmatprep.mubr.msk.f32.mxu0 %vm107_vm0, %v103_v18 }
  0x24   :  { %1342 = vmatmul.mubr.msk.f32.gmra.mrb[12].mxu0 %vm107_vm0, %v104_v19 }
  0x25   :  { %1344 = vmatprep.mubr.msk.f32.mxu0 %vm107_vm0, %v105_v20 }
  0x28   :  { %1345 = vmatmul.mubr.msk.f32.gmra.mrb[14].mxu0 %vm107_vm0, %v106_v21 }
  0xdf   :  { %v1325_v27 = vpop.f32.mrb[0].mxu0 }
  0xe0   :  { %v302_v29 = vsel %vm107_vm0, %v1325_v27, 0.0  ;;  %v222_v30 = vpop.f32.mrb[1].mxu0 }
  0xe1   :  { %v301_v31 = vsel %vm107_vm0, %v222_v30, 0.0 }
  0xe2   :  { %v303_v32 = vadd.f32 %v302_v29, %v301_v31 }
  0xe3   :  { %v1328_v33 = vpop.f32.mrb[2].mxu0 }
  0xe4   :  { %v232_v34 = vpop.f32.mrb[3].mxu0  ;;  %v306_v37 = vsel %vm107_vm0, %v1328_v33, 0.0 }
  0xe5   :  { %v304_v35 = vsel %vm107_vm0, %v232_v34, 0.0 }
  0xe6   :  { %v305_v36 = vadd.f32 %v304_v35, %v303_v32 }
  0xe7   :  { %v1331_v38 = vpop.f32.mrb[4].mxu0 }
  0xe8   :  { %v242_v39 = vpop.f32.mrb[5].mxu0  ;;  %v307_v40 = vadd.f32 %v306_v37, %v305_v36  ;;  %v310_v43 = vsel %vm107_vm0, %v1331_v38, 0.0 }
  0xe9   :  { %v308_v41 = vsel %vm107_vm0, %v242_v39, 0.0 }
  0xea   :  { %v309_v42 = vadd.f32 %v308_v41, %v307_v40 }
  0xeb   :  { %v1334_v44 = vpop.f32.mrb[6].mxu0 }
  0xec   :  { %v252_v45 = vpop.f32.mrb[7].mxu0  ;;  %v311_v46 = vadd.f32 %v310_v43, %v309_v42  ;;  %v314_v49 = vsel %vm107_vm0, %v1334_v44, 0.0 }
  0xed   :  { %v312_v47 = vsel %vm107_vm0, %v252_v45, 0.0 }
  0xee   :  { %v313_v48 = vadd.f32 %v312_v47, %v311_v46 }
  0xef   :  { %v1337_v50 = vpop.f32.mrb[8].mxu0 }
  0xf0   :  { %v262_v51 = vpop.f32.mrb[9].mxu0  ;;  %v315_v52 = vadd.f32 %v314_v49, %v313_v48  ;;  %v318_v55 = vsel %vm107_vm0, %v1337_v50, 0.0 }
  0xf1   :  { %v316_v53 = vsel %vm107_vm0, %v262_v51, 0.0 }
  0xf2   :  { %v317_v54 = vadd.f32 %v316_v53, %v315_v52 }
  0xf3   :  { %v1340_v56 = vpop.f32.mrb[10].mxu0 }
  0xf4   :  { %v272_v57 = vpop.f32.mrb[11].mxu0  ;;  %v319_v58 = vadd.f32 %v318_v55, %v317_v54  ;;  %v322_v61 = vsel %vm107_vm0, %v1340_v56, 0.0 }
  0xf5   :  { %v320_v59 = vsel %vm107_vm0, %v272_v57, 0.0 }
  0xf6   :  { %v321_v60 = vadd.f32 %v320_v59, %v319_v58 }
  0xf7   :  { %v1343_v62 = vpop.f32.mrb[12].mxu0 }
  0xf8   :  { %v282_v63 = vpop.f32.mrb[13].mxu0  ;;  %v323_v0 = vadd.f32 %v322_v61, %v321_v60  ;;  %v326_v3 = vsel %vm107_vm0, %v1343_v62, 0.0 }
  0xf9   :  { %v324_v1 = vsel %vm107_vm0, %v282_v63, 0.0 }
  0xfa   :  { %v325_v2 = vadd.f32 %v324_v1, %v323_v0 }
  0xfb   :  { %v1346_v4 = vpop.f32.mrb[14].mxu0 }
  0xfc   :  { %v292_v5 = vpop.f32.mrb[15].mxu0  ;;  %v327_v6 = vadd.f32 %v326_v3, %v325_v2  ;;  %v330_v9 = vsel %vm107_vm0, %v1346_v4, 0.0 }
  0xfd   :  { %v328_v7 = vsel %vm107_vm0, %v292_v5, 0.0 }
  0xfe   :  { %v329_v8 = vadd.f32 %v328_v7, %v327_v6 }
 0x100   :  { %v331_v10 = vadd.f32 %v330_v9, %v329_v8 }
 0x102   :  { %v332_v11 = vrot.slane %v331_v10, 4 }
 0x104   :  { %v333_v12 = vadd.f32 %v332_v11, %v331_v10 }
 0x106   :  { %v334_v13 = vrot.slane %v333_v12, 2 }
 0x108   :  { %v335_v14 = vadd.f32 %v334_v13, %v333_v12 }
 0x10a   :  { %v336_v15 = vrot.slane %v335_v14, 1 }
 0x10c   :  { %v337_v16 = vadd.f32 %v336_v15, %v335_v14 }
 0x10e   :  { %v338_v17 = vmul.f32 0.125, %v337_v16 }
 0x110   :  { %v1580_v18 = vsub.f32 %v222_v30, %v338_v17  ;;  %v340_v19 = vsub.f32 %v1325_v27, %v338_v17  ;;  %v341_v20 = vsub.f32 %v232_v34, %v338_v17  ;;  %v342_v21 = vsub.f32 %v1328_v33, %v338_v17 }
 0x111   :  { %v343_v22 = vsub.f32 %v242_v39, %v338_v17  ;;  %v344_v23 = vsub.f32 %v1331_v38, %v338_v17  ;;  %v345_v24 = vsub.f32 %v252_v45, %v338_v17  ;;  %v346_v25 = vsub.f32 %v1334_v44, %v338_v17 }
 0x112   :  { %v347_v26 = vsub.f32 %v262_v51, %v338_v17  ;;  %v348_v28 = vsub.f32 %v1337_v50, %v338_v17  ;;  %v349_v29 = vsub.f32 %v272_v57, %v338_v17  ;;  %v350_v31 = vsub.f32 %v1340_v56, %v338_v17 }
 0x113   :  { %v351_v32 = vsub.f32 %v282_v63, %v338_v17  ;;  %v352_v35 = vsub.f32 %v1343_v62, %v338_v17  ;;  %v353_v36 = vsub.f32 %v292_v5, %v338_v17  ;;  %v354_v37 = vsub.f32 %v1346_v4, %v338_v17 }
 0x114   :  { %v1582_v40 = vmul.f32 0.0, %v340_v19  ;;  %v1584_v41 = vmul.f32 0.0, %v341_v20  ;;  %v1586_v30 = vmul.f32 0.0, %v342_v21  ;;  %v371_v27 = vmul.f32 %v1580_v18, %v1580_v18 }
 0x115   :  { %v1591_v34 = vmul.f32 0.0, %v343_v22  ;;  %v1594_v39 = vmul.f32 0.0, %v344_v23  ;;  %v1599_v46 = vmul.f32 0.0, %v345_v24  ;;  %v1603_v50 = vmul.f32 0.0, %v346_v25 }
 0x116   :  { %v372_v33 = vmul.f32 %v1582_v40, %v340_v19  ;;  %v373_v38 = vmul.f32 %v1584_v41, %v341_v20  ;;  %v374_v42 = vmul.f32 %v1586_v30, %v342_v21  ;;  %v387_v43 = vsel %vm107_vm0, %v371_v27, 0.0 }
 0x117   :  { %v375_v47 = vmul.f32 %v1591_v34, %v343_v22  ;;  %v376_v51 = vmul.f32 %v1594_v39, %v344_v23  ;;  %v1607_v54 = vmul.f32 0.0, %v347_v26  ;;  %v377_v55 = vmul.f32 %v1599_v46, %v345_v24 }
 0x118   :  { %v388_v44 = vsel %vm107_vm0, %v372_v33, 0.0  ;;  %v390_v48 = vsel %vm107_vm0, %v373_v38, 0.0  ;;  %v392_v52 = vsel %vm107_vm0, %v374_v42, 0.0  ;;  %v1611_v58 = vmul.f32 0.0, %v348_v28 }
 0x119   :  { %v389_v45 = vadd.f32 %v388_v44, %v387_v43  ;;  %v394_v56 = vsel %vm107_vm0, %v375_v47, 0.0  ;;  %v378_v59 = vmul.f32 %v1603_v50, %v346_v25  ;;  %v396_v60 = vsel %vm107_vm0, %v376_v51, 0.0 }
 0x11a   :  { %v1615_v62 = vmul.f32 0.0, %v349_v29  ;;  %v379_v63 = vmul.f32 %v1607_v54, %v347_v26  ;;  %v398_v0 = vsel %vm107_vm0, %v377_v55, 0.0  ;;  %v1619_v2 = vmul.f32 0.0, %v350_v31 }
 0x11b   :  { %v391_v49 = vadd.f32 %v390_v48, %v389_v45  ;;  %v380_v3 = vmul.f32 %v1611_v58, %v348_v28  ;;  %v400_v4 = vsel %vm107_vm0, %v378_v59, 0.0  ;;  %v1623_v6 = vmul.f32 0.0, %v351_v32 }
 0x11c   :  { %v381_v7 = vmul.f32 %v1615_v62, %v349_v29  ;;  %v402_v8 = vsel %vm107_vm0, %v379_v63, 0.0  ;;  %v1627_v10 = vmul.f32 0.0, %v352_v35  ;;  %v382_v11 = vmul.f32 %v1619_v2, %v350_v31 }
 0x11d   :  { %v393_v53 = vadd.f32 %v392_v52, %v391_v49  ;;  %v404_v12 = vsel %vm107_vm0, %v380_v3, 0.0  ;;  %v369_v14 = vmul.f32 0.0, %v353_v36  ;;  %v383_v15 = vmul.f32 %v1623_v6, %v351_v32  ;;  %v85_v49 = vld [vmem:[%s1950_s1 + $0x40] sm:$0x1] }
 0x11e   :  { %v406_v16 = vsel %vm107_vm0, %v381_v7, 0.0  ;;  %v1633_v19 = vmul.f32 0.0, %v354_v37  ;;  %v384_v20 = vmul.f32 %v1627_v10, %v352_v35  ;;  %v408_v21 = vsel %vm107_vm0, %v382_v11, 0.0 }
 0x11f   :  { %v395_v57 = vadd.f32 %v394_v56, %v393_v53  ;;  %v385_v23 = vmul.f32 %v369_v14, %v353_v36  ;;  %v410_v24 = vsel %vm107_vm0, %v383_v15, 0.0  ;;  %v428_v48 = vlaneseq  ;;  %v1655_v56 = vld [vmem:[%s1950_s1 + $0x41] ss:$0 sm:$0xff] }
 0x120   :  { %v386_v26 = vmul.f32 %v1633_v19, %v354_v37  ;;  %v412_v28 = vsel %vm107_vm0, %v384_v20, 0.0 }
 0x121   :  { %v397_v61 = vadd.f32 %v396_v60, %v395_v57  ;;  %v414_v31 = vsel %vm107_vm0, %v385_v23, 0.0  ;;  %v1643_v37 = vshrl.u32 %v428_v48, 7 }
 0x122   :  { %v416_v27 = vsel %vm107_vm0, %v386_v26, 0.0 }
 0x123   :  { %v399_v1 = vadd.f32 %v398_v0, %v397_v61  ;;  %v1649_v51 = vsub.s32 0, %v1643_v37 }
 0x125   :  { %v401_v5 = vadd.f32 %v400_v4, %v399_v1 }
 0x127   :  { %v403_v9 = vadd.f32 %v402_v8, %v401_v5 }
 0x129   :  { %v405_v13 = vadd.f32 %v404_v12, %v403_v9 }
 0x12b   :  { %v407_v17 = vadd.f32 %v406_v16, %v405_v13 }
 0x12d   :  { %v409_v22 = vadd.f32 %v408_v21, %v407_v17 }
 0x12f   :  { %v411_v25 = vadd.f32 %v410_v24, %v409_v22 }
 0x131   :  { %v413_v29 = vadd.f32 %v412_v28, %v411_v25 }
 0x133   :  { %v415_v32 = vadd.f32 %v414_v31, %v413_v29 }
 0x135   :  { %v417_v33 = vadd.f32 %v416_v27, %v415_v32 }
 0x137   :  { %v418_v38 = vrot.slane %v417_v33, 4 }
 0x139   :  { %v419_v35 = vadd.f32 %v418_v38, %v417_v33 }
 0x13b   :  { %v420_v42 = vrot.slane %v419_v35, 2 }
 0x13d   :  { %v421_v43 = vadd.f32 %v420_v42, %v419_v35 }
 0x13f   :  { %v422_v44 = vrot.slane %v421_v43, 1 }
 0x141   :  { %v423_v36 = vadd.f32 %v422_v44, %v421_v43 }
 0x143   :  { %v424_v45 = vmul.f32 0.125, %v423_v36 }
 0x145   :  { %v425_v47 = vadd.f32 1e-05, %v424_v45 }
 0x147   :  { %1399 = vrsqrt.f32 %v425_v47 }
 0x151   :  { %v1400_v52 = vpop.eup %1399 }
 0x152   :  { %v427_v53 = vmul.f32 %v1400_v52, %v85_v49 }
 0x154   :  { %v431_v55 = vrot.slane %v427_v53, %v1649_v51 }
 0x156   :  { %v446_v57 = vmul.f32 %v431_v55, %v369_v14  ;;  %v432_v59 = vmul.f32 %v431_v55, %v1580_v18  ;;  %v433_v60 = vmul.f32 %v431_v55, %v1582_v40  ;;  %v434_v61 = vmul.f32 %v431_v55, %v1584_v41 }
 0x157   :  { %v435_v63 = vmul.f32 %v431_v55, %v1586_v30  ;;  %v436_v0 = vmul.f32 %v431_v55, %v1591_v34  ;;  %v437_v1 = vmul.f32 %v431_v55, %v1594_v39  ;;  %v438_v3 = vmul.f32 %v431_v55, %v1599_v46 }
 0x158   :  { %v452_v4 = vadd.f32 %v1655_v56, %v432_v59  ;;  %v453_v5 = vadd.f32 %v1655_v56, %v433_v60  ;;  %v454_v7 = vadd.f32 %v1655_v56, %v434_v61  ;;  %v439_v11 = vmul.f32 %v431_v55, %v1603_v50 }
 0x159   :  { %v455_v18 = vadd.f32 %v1655_v56, %v435_v63  ;;  %v456_v40 = vadd.f32 %v1655_v56, %v436_v0  ;;  %v457_v34 = vadd.f32 %v1655_v56, %v437_v1  ;;  %v440_v12 = vmul.f32 %v431_v55, %v1607_v54 }
 0x15a   :  { %v484_v8 = vmax.f32 %v452_v4, 0.0  ;;  %v469_v41 = vmul.f32 0.0, %v453_v5  ;;  %v470_v9 = vmul.f32 0.0, %v454_v7  ;;  %v458_v14 = vadd.f32 %v1655_v56, %v438_v3 }
 0x15b   :  { %v471_v30 = vmul.f32 0.0, %v455_v18  ;;  %v472_v13 = vmul.f32 0.0, %v456_v40  ;;  %v441_v15 = vmul.f32 %v431_v55, %v1611_v58  ;;  %v442_v16 = vmul.f32 %v431_v55, %v1615_v62 }
 0x15c   :  { %1355 = vmatprep.mubr.msk.f32.mxu1 %vm107_vm0, %v484_v8  ;;  %v485_v39 = vmax.f32 %v469_v41, 0.0  ;;  %v486_v46 = vmax.f32 %v470_v9, 0.0  ;;  %v443_v17 = vmul.f32 %v431_v55, %v1619_v2  ;;  %v444_v20 = vmul.f32 %v431_v55, %v1623_v6 }
 0x15d   :  { %v445_v21 = vmul.f32 %v431_v55, %v1627_v10  ;;  %v487_v50 = vmax.f32 %v471_v30, 0.0  ;;  %v473_v22 = vmul.f32 0.0, %v457_v34  ;;  %v459_v54 = vadd.f32 %v1655_v56, %v439_v11 }
 0x15e   :  { %1356 = vmatmul.mubr.msk.f32.vlgmr.msra.gmra.mrb[0].mxu1 %vm107_vm0, %v485_v39  ;;  %v488_v23 = vmax.f32 %v472_v13, 0.0  ;;  %v474_v24 = vmul.f32 0.0, %v458_v14  ;;  %v460_v25 = vadd.f32 %v1655_v56, %v440_v12  ;;  %v447_v58 = vmul.f32 %v431_v55, %v1633_v19 }
 0x15f   :  { %1358 = vmatprep.mubr.msk.f32.mxu1 %vm107_vm0, %v486_v46  ;;  %v489_v62 = vmax.f32 %v473_v22, 0.0  ;;  %v475_v2 = vmul.f32 0.0, %v459_v54  ;;  %v461_v6 = vadd.f32 %v1655_v56, %v441_v15  ;;  %v462_v28 = vadd.f32 %v1655_v56, %v442_v16 }
 0x160   :  { %v490_v26 = vmax.f32 %v474_v24, 0.0  ;;  %v476_v10 = vmul.f32 0.0, %v460_v25  ;;  %v463_v19 = vadd.f32 %v1655_v56, %v443_v17  ;;  %v464_v33 = vadd.f32 %v1655_v56, %v444_v20 }
 0x161   :  { %v491_v29 = vmax.f32 %v475_v2, 0.0  ;;  %v477_v31 = vmul.f32 0.0, %v461_v6  ;;  %v478_v27 = vmul.f32 0.0, %v462_v28  ;;  %v465_v42 = vadd.f32 %v1655_v56, %v445_v21 }
 0x162   :  { %1359 = vmatmul.mubr.msk.f32.gmra.mrb[2].mxu1 %vm107_vm0, %v487_v50  ;;  %v492_v32 = vmax.f32 %v476_v10, 0.0  ;;  %v479_v35 = vmul.f32 0.0, %v463_v19  ;;  %v466_v43 = vadd.f32 %v1655_v56, %v446_v57  ;;  %v480_v36 = vmul.f32 0.0, %v464_v33 }
 0x163   :  { %1361 = vmatprep.mubr.msk.f32.mxu1 %vm107_vm0, %v488_v23  ;;  %v493_v38 = vmax.f32 %v477_v31, 0.0  ;;  %v494_v44 = vmax.f32 %v478_v27, 0.0  ;;  %v481_v47 = vmul.f32 0.0, %v465_v42  ;;  %v467_v49 = vadd.f32 %v1655_v56, %v447_v58 }
 0x164   :  { %v495_v45 = vmax.f32 %v479_v35, 0.0  ;;  %v482_v52 = vmul.f32 0.0, %v466_v43  ;;  %v496_v53 = vmax.f32 %v480_v36, 0.0 }
 0x165   :  { %v497_v55 = vmax.f32 %v481_v47, 0.0  ;;  %v483_v59 = vmul.f32 0.0, %v467_v49 }
 0x166   :  { %1362 = vmatmul.mubr.msk.f32.gmra.mrb[4].mxu1 %vm107_vm0, %v489_v62  ;;  %v498_v60 = vmax.f32 %v482_v52, 0.0 }
 0x167   :  { %1364 = vmatprep.mubr.msk.f32.mxu1 %vm107_vm0, %v490_v26  ;;  %v499_v57 = vmax.f32 %v483_v59, 0.0 }
 0x16a   :  { %1365 = vmatmul.mubr.msk.f32.gmra.mrb[6].mxu1 %vm107_vm0, %v491_v29 }
 0x16b   :  { %1367 = vmatprep.mubr.msk.f32.mxu1 %vm107_vm0, %v492_v32  ;;  %v1459_v32 = vmov 0  }
 0x16c   :  { %1397 = vset.pattern.permute.xlu1 %v1459_v32  ;;  %1398 = vset.pattern.permute.xlu0 %v1459_v32 }
 0x16e   :  { %1368 = vmatmul.mubr.msk.f32.gmra.mrb[8].mxu1 %vm107_vm0, %v493_v38 }
 0x16f   :  { %1370 = vmatprep.mubr.msk.f32.mxu1 %vm107_vm0, %v494_v44 }
 0x172   :  { %1371 = vmatmul.mubr.msk.f32.gmra.mrb[10].mxu1 %vm107_vm0, %v495_v45 }
 0x173   :  { %1373 = vmatprep.mubr.msk.f32.mxu1 %vm107_vm0, %v496_v53 }
 0x176   :  { %1374 = vmatmul.mubr.msk.f32.gmra.mrb[12].mxu1 %vm107_vm0, %v497_v55 }
 0x177   :  { %1376 = vmatprep.mubr.msk.f32.mxu1 %vm107_vm0, %v498_v60 }
 0x17a   :  { %1377 = vmatmul.mubr.msk.f32.gmra.mrb[14].mxu1 %vm107_vm0, %v499_v57 }
 0x231   :  { %v1357_v61 = vpop.f32.mrb[0].mxu1 }
 0x232   :  { %v694_v63 = vsel %vm107_vm0, %v1357_v61, 0.0  ;;  %v614_v56 = vpop.f32.mrb[1].mxu1 }
 0x233   :  { %v693_v0 = vsel %vm107_vm0, %v614_v56, 0.0 }
 0x234   :  { %v695_v1 = vadd.f32 %v694_v63, %v693_v0 }
 0x235   :  { %v1360_v3 = vpop.f32.mrb[2].mxu1 }
 0x236   :  { %v624_v4 = vpop.f32.mrb[3].mxu1  ;;  %v698_v18 = vsel %vm107_vm0, %v1360_v3, 0.0 }
 0x237   :  { %v696_v5 = vsel %vm107_vm0, %v624_v4, 0.0 }
 0x238   :  { %v697_v7 = vadd.f32 %v696_v5, %v695_v1 }
 0x239   :  { %v1363_v40 = vpop.f32.mrb[4].mxu1 }
 0x23a   :  { %v634_v8 = vpop.f32.mrb[5].mxu1  ;;  %v699_v41 = vadd.f32 %v698_v18, %v697_v7  ;;  %v702_v34 = vsel %vm107_vm0, %v1363_v40, 0.0 }
 0x23b   :  { %v700_v9 = vsel %vm107_vm0, %v634_v8, 0.0 }
 0x23c   :  { %v701_v30 = vadd.f32 %v700_v9, %v699_v41 }
 0x23d   :  { %v1366_v39 = vpop.f32.mrb[6].mxu1 }
 0x23e   :  { %v644_v46 = vpop.f32.mrb[7].mxu1  ;;  %v703_v11 = vadd.f32 %v702_v34, %v701_v30  ;;  %v706_v14 = vsel %vm107_vm0, %v1366_v39, 0.0 }
 0x23f   :  { %v704_v12 = vsel %vm107_vm0, %v644_v46, 0.0 }
 0x240   :  { %v705_v13 = vadd.f32 %v704_v12, %v703_v11 }
 0x241   :  { %v1369_v15 = vpop.f32.mrb[8].mxu1 }
 0x242   :  { %v654_v16 = vpop.f32.mrb[9].mxu1  ;;  %v707_v17 = vadd.f32 %v706_v14, %v705_v13  ;;  %v710_v50 = vsel %vm107_vm0, %v1369_v15, 0.0 }
 0x243   :  { %v708_v20 = vsel %vm107_vm0, %v654_v16, 0.0 }
 0x244   :  { %v709_v21 = vadd.f32 %v708_v20, %v707_v17 }
 0x245   :  { %v1372_v22 = vpop.f32.mrb[10].mxu1 }
 0x246   :  { %v664_v54 = vpop.f32.mrb[11].mxu1  ;;  %v711_v23 = vadd.f32 %v710_v50, %v709_v21  ;;  %v714_v58 = vsel %vm107_vm0, %v1372_v22, 0.0 }
 0x247   :  { %v712_v24 = vsel %vm107_vm0, %v664_v54, 0.0 }
 0x248   :  { %v713_v25 = vadd.f32 %v712_v24, %v711_v23 }
 0x249   :  { %v1375_v62 = vpop.f32.mrb[12].mxu1 }
 0x24a   :  { %v674_v2 = vpop.f32.mrb[13].mxu1  ;;  %v715_v6 = vadd.f32 %v714_v58, %v713_v25  ;;  %v718_v28 = vsel %vm107_vm0, %v1375_v62, 0.0 }
 0x24b   :  { %v716_v26 = vsel %vm107_vm0, %v674_v2, 0.0 }
 0x24c   :  { %v717_v10 = vadd.f32 %v716_v26, %v715_v6 }
 0x24d   :  { %v1378_v29 = vpop.f32.mrb[14].mxu1 }
 0x24e   :  { %v684_v31 = vpop.f32.mrb[15].mxu1  ;;  %v719_v19 = vadd.f32 %v718_v28, %v717_v10  ;;  %v722_v38 = vsel %vm107_vm0, %v1378_v29, 0.0 }
 0x24f   :  { %v720_v27 = vsel %vm107_vm0, %v684_v31, 0.0 }
 0x250   :  { %v721_v33 = vadd.f32 %v720_v27, %v719_v19 }
 0x252   :  { %v723_v35 = vadd.f32 %v722_v38, %v721_v33 }
 0x254   :  { %v724_v42 = vrot.slane %v723_v35, 4 }
 0x256   :  { %v725_v43 = vadd.f32 %v724_v42, %v723_v35 }
 0x258   :  { %v726_v44 = vrot.slane %v725_v43, 2 }
 0x25a   :  { %v727_v36 = vadd.f32 %v726_v44, %v725_v43 }
 0x25c   :  { %v728_v45 = vrot.slane %v727_v36, 1 }
 0x25e   :  { %v729_v47 = vadd.f32 %v728_v45, %v727_v36 }
 0x260   :  { %v730_v49 = vmul.f32 0.125, %v729_v47 }
 0x262   :  { %v1720_v52 = vsub.f32 %v614_v56, %v730_v49  ;;  %v732_v53 = vsub.f32 %v1357_v61, %v730_v49  ;;  %v733_v55 = vsub.f32 %v624_v4, %v730_v49  ;;  %v734_v59 = vsub.f32 %v1360_v3, %v730_v49 }
 0x263   :  { %v735_v60 = vsub.f32 %v634_v8, %v730_v49  ;;  %v736_v57 = vsub.f32 %v1363_v40, %v730_v49  ;;  %v737_v63 = vsub.f32 %v644_v46, %v730_v49  ;;  %v738_v0 = vsub.f32 %v1366_v39, %v730_v49 }
 0x264   :  { %v739_v1 = vsub.f32 %v654_v16, %v730_v49  ;;  %v740_v5 = vsub.f32 %v1369_v15, %v730_v49  ;;  %v741_v7 = vsub.f32 %v664_v54, %v730_v49  ;;  %v742_v18 = vsub.f32 %v1372_v22, %v730_v49 }
 0x265   :  { %v743_v41 = vsub.f32 %v674_v2, %v730_v49  ;;  %v744_v9 = vsub.f32 %v1375_v62, %v730_v49  ;;  %v745_v30 = vsub.f32 %v684_v31, %v730_v49  ;;  %v746_v34 = vsub.f32 %v1378_v29, %v730_v49 }
 0x266   :  { %v1722_v11 = vmul.f32 0.0, %v732_v53  ;;  %v1724_v12 = vmul.f32 0.0, %v733_v55  ;;  %v1726_v56 = vmul.f32 0.0, %v734_v59  ;;  %v763_v61 = vmul.f32 %v1720_v52, %v1720_v52 }
 0x267   :  { %v1731_v4 = vmul.f32 0.0, %v735_v60  ;;  %v1734_v8 = vmul.f32 0.0, %v736_v57  ;;  %v1739_v15 = vmul.f32 0.0, %v737_v63  ;;  %v1743_v21 = vmul.f32 0.0, %v738_v0 }
 0x268   :  { %v764_v3 = vmul.f32 %v1722_v11, %v732_v53  ;;  %v765_v40 = vmul.f32 %v1724_v12, %v733_v55  ;;  %v766_v39 = vmul.f32 %v1726_v56, %v734_v59  ;;  %v779_v46 = vsel %vm107_vm0, %v763_v61, 0.0 }
 0x269   :  { %v767_v16 = vmul.f32 %v1731_v4, %v735_v60  ;;  %v768_v50 = vmul.f32 %v1734_v8, %v736_v57  ;;  %v1747_v23 = vmul.f32 0.0, %v739_v1  ;;  %v769_v24 = vmul.f32 %v1739_v15, %v737_v63 }
 0x26a   :  { %v780_v13 = vsel %vm107_vm0, %v764_v3, 0.0  ;;  %v782_v17 = vsel %vm107_vm0, %v765_v40, 0.0  ;;  %v784_v22 = vsel %vm107_vm0, %v766_v39, 0.0  ;;  %v1751_v62 = vmul.f32 0.0, %v740_v5 }
 0x26b   :  { %v781_v14 = vadd.f32 %v780_v13, %v779_v46  ;;  %v786_v25 = vsel %vm107_vm0, %v767_v16, 0.0  ;;  %v770_v2 = vmul.f32 %v1743_v21, %v738_v0  ;;  %v788_v6 = vsel %vm107_vm0, %v768_v50, 0.0 }
 0x26c   :  { %v1755_v10 = vmul.f32 0.0, %v741_v7  ;;  %v771_v28 = vmul.f32 %v1747_v23, %v739_v1  ;;  %v790_v29 = vsel %vm107_vm0, %v769_v24, 0.0  ;;  %v1759_v19 = vmul.f32 0.0, %v742_v18 }
 0x26d   :  { %v783_v20 = vadd.f32 %v782_v17, %v781_v14  ;;  %v772_v32 = vmul.f32 %v1751_v62, %v740_v5  ;;  %v792_v27 = vsel %vm107_vm0, %v770_v2, 0.0  ;;  %v1763_v38 = vmul.f32 0.0, %v743_v41 }
 0x26e   :  { %v773_v35 = vmul.f32 %v1755_v10, %v741_v7  ;;  %v794_v42 = vsel %vm107_vm0, %v771_v28, 0.0  ;;  %v1767_v44 = vmul.f32 0.0, %v744_v9  ;;  %v774_v36 = vmul.f32 %v1759_v19, %v742_v18 }
 0x26f   :  { %v785_v54 = vadd.f32 %v784_v22, %v783_v20  ;;  %v796_v45 = vsel %vm107_vm0, %v772_v32, 0.0  ;;  %v761_v49 = vmul.f32 0.0, %v745_v30  ;;  %v775_v53 = vmul.f32 %v1763_v38, %v743_v41 }
 0x270   :  { %v798_v55 = vsel %vm107_vm0, %v773_v35, 0.0  ;;  %v1773_v60 = vmul.f32 0.0, %v746_v34  ;;  %v776_v57 = vmul.f32 %v1767_v44, %v744_v9  ;;  %v800_v63 = vsel %vm107_vm0, %v774_v36, 0.0 }
 0x271   :  { %v787_v58 = vadd.f32 %v786_v25, %v785_v54  ;;  %v777_v1 = vmul.f32 %v761_v49, %v745_v30  ;;  %v802_v5 = vsel %vm107_vm0, %v775_v53, 0.0  ;;  %v1791_v25 = vld [vmem:[%s1950_s1 + $0x43] ss:$0 sm:$0xff] }
 0x272   :  { %v778_v18 = vmul.f32 %v1773_v60, %v746_v34  ;;  %v804_v61 = vsel %vm107_vm0, %v776_v57, 0.0  ;;  %v87_v34 = vld [vmem:[%s1950_s1 + $0x42] sm:$0x1] }
 0x273   :  { %v789_v26 = vadd.f32 %v788_v6, %v787_v58  ;;  %v806_v41 = vsel %vm107_vm0, %v777_v1, 0.0 }
 0x274   :  { %v808_v39 = vsel %vm107_vm0, %v778_v18, 0.0 }
 0x275   :  { %v791_v31 = vadd.f32 %v790_v29, %v789_v26 }
 0x277   :  { %v793_v33 = vadd.f32 %v792_v27, %v791_v31 }
 0x279   :  { %v795_v43 = vadd.f32 %v794_v42, %v793_v33 }
 0x27b   :  { %v797_v47 = vadd.f32 %v796_v45, %v795_v43 }
 0x27d   :  { %v799_v59 = vadd.f32 %v798_v55, %v797_v47 }
 0x27f   :  { %v801_v0 = vadd.f32 %v800_v63, %v799_v59 }
 0x281   :  { %v803_v7 = vadd.f32 %v802_v5, %v801_v0 }
 0x283   :  { %v805_v3 = vadd.f32 %v804_v61, %v803_v7 }
 0x285   :  { %v807_v40 = vadd.f32 %v806_v41, %v805_v3 }
 0x287   :  { %v809_v46 = vadd.f32 %v808_v39, %v807_v40 }
 0x289   :  { %v810_v13 = vrot.slane %v809_v46, 4 }
 0x28b   :  { %v811_v9 = vadd.f32 %v810_v13, %v809_v46 }
 0x28d   :  { %v812_v14 = vrot.slane %v811_v9, 2 }
 0x28f   :  { %v813_v16 = vadd.f32 %v812_v14, %v811_v9 }
 0x291   :  { %v814_v17 = vrot.slane %v813_v16, 1 }
 0x293   :  { %v815_v30 = vadd.f32 %v814_v17, %v813_v16 }
 0x295   :  { %v816_v20 = vmul.f32 0.125, %v815_v30 }
 0x297   :  { %v817_v50 = vadd.f32 1e-05, %v816_v20 }
 0x299   :  { %1401 = vrsqrt.f32 %v817_v50 }
 0x2a3   :  { %v1402_v22 = vpop.eup %1401 }
 0x2a4   :  { %v819_v54 = vmul.f32 %v1402_v22, %v87_v34 }
 0x2a6   :  { %v1786_v24 = vrot.slane %v819_v54, %v1649_v51 }
 0x2a8   :  { %v1794_v58 = vmul.f32 %v1786_v24, %v761_v49  ;;  %v824_v2 = vmul.f32 %v1786_v24, %v1720_v52  ;;  %v826_v6 = vmul.f32 %v1786_v24, %v1724_v12  ;;  %v825_v26 = vmul.f32 %v1786_v24, %v1722_v11 }
 0x2a9   :  { %v827_v28 = vmul.f32 %v1786_v24, %v1726_v56  ;;  %v828_v29 = vmul.f32 %v1786_v24, %v1731_v4  ;;  %v829_v31 = vmul.f32 %v1786_v24, %v1734_v8  ;;  %v830_v32 = vmul.f32 %v1786_v24, %v1739_v15  ;;  %v1818_v56 = vld [vmem:[%s1950_s1 + $0x44] ss:$0 sm:$0xff] }
 0x2aa   :  { %v844_v52 = vadd.f32 %v1791_v25, %v824_v2  ;;  %v846_v27 = vadd.f32 %v1791_v25, %v826_v6  ;;  %v845_v12 = vadd.f32 %v1791_v25, %v825_v26  ;;  %v831_v11 = vmul.f32 %v1786_v24, %v1743_v21 }
 0x2ab   :  { %v847_v4 = vadd.f32 %v1791_v25, %v827_v28  ;;  %v848_v8 = vadd.f32 %v1791_v25, %v828_v29  ;;  %v849_v15 = vadd.f32 %v1791_v25, %v829_v31  ;;  %v850_v33 = vadd.f32 %v1791_v25, %v830_v32 }
 0x2ac   :  { %v876_v35 = vmax.f32 %v844_v52, 0.0  ;;  %v862_v42 = vmul.f32 0.0, %v846_v27  ;;  %v861_v43 = vmul.f32 0.0, %v845_v12  ;;  %v851_v57 = vadd.f32 %v1791_v25, %v831_v11 }
 0x2ad   :  { %v863_v36 = vmul.f32 0.0, %v847_v4  ;;  %v864_v45 = vmul.f32 0.0, %v848_v8  ;;  %v865_v53 = vmul.f32 0.0, %v849_v15  ;;  %v866_v59 = vmul.f32 0.0, %v850_v33 }
 0x2ae   :  { %v896_v21 = vmul.f32 %v1818_v56, %v876_v35  ;;  %v878_v47 = vmax.f32 %v862_v42, 0.0  ;;  %v877_v49 = vmax.f32 %v861_v43, 0.0  ;;  %v832_v3 = vmul.f32 %v1786_v24, %v1747_v23 }
 0x2af   :  { %v879_v55 = vmax.f32 %v863_v36, 0.0  ;;  %v880_v5 = vmax.f32 %v864_v45, 0.0  ;;  %v881_v61 = vmax.f32 %v865_v53, 0.0  ;;  %v882_v41 = vmax.f32 %v866_v59, 0.0  ;;  %v90_v36 = vld [vmem:[%s1950_s1 + $0x45] sm:$0x1] }
 0x2b0   :  { %v912_v63 = vsel %vm107_vm0, %v896_v21, 0.0  ;;  %v898_v0 = vmul.f32 %v1818_v56, %v878_v47  ;;  %v897_v1 = vmul.f32 %v1818_v56, %v877_v49  ;;  %v867_v40 = vmul.f32 0.0, %v851_v57  ;;  %s1460_s1 = smov [#allocation2]  }
 0x2b1   :  { %913 = vadd.xlane.f32.xlu0 %v912_v63  ;;  %v899_v18 = vmul.f32 %v1818_v56, %v879_v55  ;;  %v900_v46 = vmul.f32 %v1818_v56, %v880_v5  ;;  %v852_v13 = vadd.f32 %v1791_v25, %v832_v3  ;;  %v833_v9 = vmul.f32 %v1786_v24, %v1751_v62  ;;  %s1232_s12 = sshll.u32 %s1460_s1, 4  ;;  %s1233_s12 = int_to_ptr.vmem [resolvable:$true] %s1232_s12 }
 0x2b2   :  { %v918_v7 = vsel %vm107_vm0, %v898_v0, 0.0  ;;  %v915_v39 = vsel %vm107_vm0, %v897_v1, 0.0  ;;  %v901_v16 = vmul.f32 %v1818_v56, %v881_v61  ;;  %v902_v23 = vmul.f32 %v1818_v56, %v882_v41  ;;  %s1435_s13 = scalar_lea.vmem %s1233_s12, 16  ;;  %s1439_s14 = scalar_lea.vmem %s1233_s12, 32 }
 0x2b3   :  { %919 = vadd.xlane.f32.xlu1 %v918_v7  ;;  %v921_v14 = vsel %vm107_vm0, %v899_v18, 0.0  ;;  %v883_v17 = vmax.f32 %v867_v40, 0.0  ;;  %v924_v30 = vsel %vm107_vm0, %v900_v46, 0.0  ;;  %v868_v20 = vmul.f32 0.0, %v852_v13  ;;  %p1436_p0 = scmp.ne.s32.totalorder %s1233_s12, %s1435_s13  ;;  %p1440_p1 = scmp.lt.s32.totalorder %s1233_s12, %s1233_s12 }
 0x2b4   :  { %v853_v50 = vadd.f32 %v1791_v25, %v833_v9  ;;  %v834_v34 = vmul.f32 %v1786_v24, %v1755_v10  ;;  %v927_v62 = vsel %vm107_vm0, %v901_v16, 0.0  ;;  %v930_v22 = vsel %vm107_vm0, %v902_v23, 0.0  ;;  %p1441_p2 = scmp.lt.s32.totalorder %s1439_s14, %s1435_s13 }
 0x2b5   :  { %916 = vadd.xlane.f32.xlu0 %v915_v39  ;;  %v903_v54 = vmul.f32 %v1818_v56, %v883_v17  ;;  %v884_v2 = vmax.f32 %v868_v20, 0.0  ;;  %v836_v28 = vmul.f32 %v1786_v24, %v1763_v38  ;;  %v837_v10 = vmul.f32 %v1786_v24, %v1767_v44 }
 0x2b6   :  { %v869_v6 = vmul.f32 0.0, %v853_v50  ;;  %v854_v26 = vadd.f32 %v1791_v25, %v834_v34  ;;  %v858_v15 = vadd.f32 %v1791_v25, %v1794_v58  ;;  %v839_v44 = vmul.f32 %v1786_v24, %v1773_v60  ;;  %p1442_p3 = por %p1441_p2, %p1440_p1 }
 0x2b7   :  { %922 = vadd.xlane.f32.xlu1 %v921_v14  ;;  %v933_v29 = vsel %vm107_vm0, %v903_v54, 0.0  ;;  %v904_v31 = vmul.f32 %v1818_v56, %v884_v2  ;;  %v856_v27 = vadd.f32 %v1791_v25, %v836_v28  ;;  %v857_v12 = vadd.f32 %v1791_v25, %v837_v10 }
 0x2b8   :  { %v885_v32 = vmax.f32 %v869_v6, 0.0  ;;  %v870_v52 = vmul.f32 0.0, %v854_v26  ;;  %v874_v45 = vmul.f32 0.0, %v858_v15  ;;  %v859_v60 = vadd.f32 %v1791_v25, %v839_v44  ;;  %p1443_p4 = pnand %p1442_p3, %p1436_p0 }
 0x2b9   :  { %925 = vadd.xlane.f32.xlu0 %v924_v30  ;;  %v936_v11 = vsel %vm107_vm0, %v904_v31, 0.0  ;;  %v872_v8 = vmul.f32 0.0, %v856_v27  ;;  %v873_v43 = vmul.f32 0.0, %v857_v12  ;;  %v835_v7 = vmul.f32 %v1786_v24, %v1759_v19 }
 0x2ba   :  { %v905_v4 = vmul.f32 %v1818_v56, %v885_v32  ;;  %v886_v38 = vmax.f32 %v870_v52, 0.0  ;;  %v890_v55 = vmax.f32 %v874_v45, 0.0  ;;  %v875_v59 = vmul.f32 0.0, %v859_v60 }
 0x2bb   :  { %928 = vadd.xlane.f32.xlu1 %v927_v62  ;;  %v888_v42 = vmax.f32 %v872_v8, 0.0  ;;  %v889_v47 = vmax.f32 %v873_v43, 0.0  ;;  %v855_v61 = vadd.f32 %v1791_v25, %v835_v7 }
 0x2bc   :  { %v939_v33 = vsel %vm107_vm0, %v905_v4, 0.0  ;;  %v906_v35 = vmul.f32 %v1818_v56, %v886_v38  ;;  %v910_v63 = vmul.f32 %v1818_v56, %v890_v55  ;;  %v891_v0 = vmax.f32 %v875_v59, 0.0 }
 0x2bd   :  { %931 = vadd.xlane.f32.xlu0 %v930_v22  ;;  %v908_v58 = vmul.f32 %v1818_v56, %v888_v42  ;;  %v909_v53 = vmul.f32 %v1818_v56, %v889_v47  ;;  %v871_v3 = vmul.f32 0.0, %v855_v61 }
 0x2be   :  { %v942_v21 = vsel %vm107_vm0, %v906_v35, 0.0  ;;  %v954_v1 = vsel %vm107_vm0, %v910_v63, 0.0  ;;  %v911_v5 = vmul.f32 %v1818_v56, %v891_v0 }
 0x2bf   :  { %v948_v49 = vsel %vm107_vm0, %v908_v58, 0.0  ;;  %v951_v57 = vsel %vm107_vm0, %v909_v53, 0.0  ;;  %v887_v41 = vmax.f32 %v871_v3, 0.0 }
 0x2c0   :  { %v957_v18 = vsel %vm107_vm0, %v911_v5, 0.0 }
 0x2c1   :  { %934 = vadd.xlane.f32.xlu0 %v933_v29  ;;  %v907_v40 = vmul.f32 %v1818_v56, %v887_v41 }
 0x2c3   :  { %v945_v39 = vsel %vm107_vm0, %v907_v40, 0.0 }
 0x2c5   :  { %937 = vadd.xlane.f32.xlu0 %v936_v11 }
 0x2c9   :  { %940 = vadd.xlane.f32.xlu0 %v939_v33 }
 0x2cc   :  { %962 = vperm.xlu1 %1397, %v90_v36  }
 0x2cd   :  { %943 = vadd.xlane.f32.xlu0 %v942_v21 }
 0x2d1   :  { %949 = vadd.xlane.f32.xlu0 %v948_v49 }
 0x2d5   :  { %952 = vadd.xlane.f32.xlu0 %v951_v57 }
 0x2d9   :  { %955 = vadd.xlane.f32.xlu0 %v954_v1 }
 0x2dd   :  { %958 = vadd.xlane.f32.xlu0 %v957_v18 }
 0x2f0   :  { %946 = vadd.xlane.f32.xlu1 %v945_v39 }
 0x33e   :  { %v914_v46 = vpop.xlane.xlu0 %913 }
 0x340   :  { %v920_v13 = vpop.xlane.xlu1 %919 }
 0x342   :  { %v917_v9 = vpop.xlane.xlu0 %916 }
 0x344   :  { %v923_v14 = vpop.xlane.xlu1 %922 }
 0x346   :  { %v926_v16 = vpop.xlane.xlu0 %925 }
 0x348   :  { %v929_v23 = vpop.xlane.xlu1 %928 }
 0x34a   :  { %v932_v17 = vpop.xlane.xlu0 %931 }
 0x34c   :  { %v963_v19 = vpop.permute.xlu1 %962 }
 0x34d   :  { %v1884_v24 = vrot.slane %v963_v19, %v1649_v51 }
 0x34e   :  { %v935_v30 = vpop.xlane.xlu0 %934 }
 0x34f   :  { %v976_v25 = vadd.f32 %v1884_v24, %v935_v30  ;;  %v969_v20 = vadd.f32 %v1884_v24, %v914_v46  ;;  %v970_v56 = vadd.f32 %v1884_v24, %v917_v9  ;;  %v974_v50 = vadd.f32 %v1884_v24, %v929_v23 }
 0x350   :  { %v971_v34 = vadd.f32 %v1884_v24, %v920_v13  ;;  %v972_v54 = vadd.f32 %v1884_v24, %v923_v14  ;;  %v973_v29 = vadd.f32 %v1884_v24, %v926_v16  ;;  %v975_v27 = vadd.f32 %v1884_v24, %v932_v17 }
 0x351   :  { %v985_v62 = vmul.f32 0.5, %v969_v20  ;;  %v986_v22 = vmul.f32 0.5, %v970_v56  ;;  %v990_v6 = vmul.f32 0.5, %v974_v50  ;;  %v992_v26 = vmul.f32 0.5, %v976_v25 }
 0x352   :  { %v938_v2 = vpop.xlane.xlu0 %937  ;;  %v987_v51 = vmul.f32 0.5, %v971_v34  ;;  %v988_v28 = vmul.f32 0.5, %v972_v54  ;;  %v989_v52 = vmul.f32 0.5, %v973_v29  ;;  %v991_v4 = vmul.f32 0.5, %v975_v27 }
 0x353   :  { %1403 = vtanh.f32 %v985_v62  ;;  %v977_v11 = vadd.f32 %v1884_v24, %v938_v2 }
 0x354   :  { %1405 = vtanh.f32 %v986_v22 }
 0x355   :  { %1407 = vtanh.f32 %v990_v6  ;;  %v993_v36 = vmul.f32 0.5, %v977_v11 }
 0x356   :  { %v941_v10 = vpop.xlane.xlu0 %940  ;;  %1409 = vtanh.f32 %v992_v26 }
 0x357   :  { %v978_v31 = vadd.f32 %v1884_v24, %v941_v10  ;;  %1411 = vtanh.f32 %v987_v51 }
 0x358   :  { %1413 = vtanh.f32 %v988_v28 }
 0x359   :  { %v994_v32 = vmul.f32 0.5, %v978_v31 }
 0x35a   :  { %v944_v12 = vpop.xlane.xlu0 %943 }
 0x35b   :  { %1415 = vtanh.f32 %v994_v32  ;;  %v979_v35 = vadd.f32 %v1884_v24, %v944_v12 }
 0x35c   :  { %1417 = vtanh.f32 %v989_v52 }
 0x35d   :  { %v1404_v38 = vpop.eup %1403  ;;  %1419 = vtanh.f32 %v991_v4  ;;  %v995_v55 = vmul.f32 0.5, %v979_v35 }
 0x35e   :  { %v950_v8 = vpop.xlane.xlu0 %949  ;;  %v1406_v15 = vpop.eup %1405  ;;  %v1017_v44 = vadd.f32 1.0, %v1404_v38  ;;  %1421 = vtanh.f32 %v993_v36 }
 0x35f   :  { %v1408_v33 = vpop.eup %1407  ;;  %v1018_v42 = vadd.f32 1.0, %v1406_v15  ;;  %v981_v57 = vadd.f32 %v1884_v24, %v950_v8  ;;  %1423 = vtanh.f32 %v995_v55 }
 0x360   :  { %v1410_v43 = vpop.eup %1409  ;;  %v1033_v45 = vmul.f32 0.5, %v1017_v44  ;;  %v1022_v21 = vadd.f32 1.0, %v1408_v33 }
 0x361   :  { %v1412_v58 = vpop.eup %1411  ;;  %v1034_v47 = vmul.f32 0.5, %v1018_v42  ;;  %v1024_v59 = vadd.f32 1.0, %v1410_v43  ;;  %v997_v3 = vmul.f32 0.5, %v981_v57  ;;  %v1903_v43 = vand.u32 127, %v428_v48 }
 0x362   :  { %v953_v60 = vpop.xlane.xlu0 %952  ;;  %v1414_v49 = vpop.eup %1413  ;;  %1066 = vperm.xlu0 %1398, %v1033_v45   ;;  %v1019_v53 = vadd.f32 1.0, %v1412_v58  ;;  %v1038_v63 = vmul.f32 0.5, %v1022_v21 }
 0x363   :  { %1069 = vperm.xlu1 %1397, %v1034_v47   ;;  %v1020_v7 = vadd.f32 1.0, %v1414_v49  ;;  %v1040_v40 = vmul.f32 0.5, %v1024_v59  ;;  %1425 = vtanh.f32 %v997_v3  ;;  %v982_v34 = vadd.f32 %v1884_v24, %v953_v60 }
 0x364   :  { %v1035_v1 = vmul.f32 0.5, %v1019_v53  ;;  %v1119_v36 = vadd.s32 4294967288, %v1903_v43  ;;  %v1126_v21 = vadd.s32 4294967280, %v1903_v43  ;;  %v1133_v58 = vadd.s32 4294967272, %v1903_v43 }
 0x365   :  { %v1416_v0 = vpop.eup %1415  ;;  %v1036_v39 = vmul.f32 0.5, %v1020_v7  ;;  %v998_v6 = vmul.f32 0.5, %v982_v34  ;;  %v1140_v60 = vadd.s32 4294967264, %v1903_v43  ;;  %v1117_v53 = vsub.s32 %v1903_v43, %v1643_v37 }
 0x366   :  { %v956_v5 = vpop.xlane.xlu0 %955  ;;  %v1418_v18 = vpop.eup %1417  ;;  %1081 = vperm.xlu0 %1398, %v1038_v63   ;;  %v1026_v61 = vadd.f32 1.0, %v1416_v0  ;;  %v1122_v49 = vsub.s32 %v1119_v36, %v1643_v37  ;;  %v1129_v55 = vsub.s32 %v1126_v21, %v1643_v37  ;;  %v1136_v48 = vsub.s32 %v1133_v58, %v1643_v37 }
 0x367   :  { %1072 = vperm.xlu1 %1397, %v1035_v1   ;;  %v983_v41 = vadd.f32 %v1884_v24, %v956_v5  ;;  %v1021_v46 = vadd.f32 1.0, %v1418_v18  ;;  %v1420_v13 = vpop.eup %1419  ;;  %v1143_v57 = vsub.s32 %v1140_v60, %v1643_v37  ;;  %v1154_v63 = vadd.s32 4294967248, %v1903_v43 }
 0x368   :  { %v1042_v14 = vmul.f32 0.5, %v1026_v61  ;;  %v1023_v23 = vadd.f32 1.0, %v1420_v13  ;;  %v1422_v17 = vpop.eup %1421  ;;  %v1147_v5 = vadd.s32 4294967256, %v1903_v43  ;;  %v1161_v13 = vadd.s32 4294967240, %v1903_v43 }
 0x369   :  { %v999_v9 = vmul.f32 0.5, %v983_v41  ;;  %v1037_v16 = vmul.f32 0.5, %v1021_v46  ;;  %v1424_v19 = vpop.eup %1423  ;;  %v1025_v30 = vadd.f32 1.0, %v1422_v17  ;;  %v1157_v41 = vsub.s32 %v1154_v63, %v1643_v37 }
 0x36a   :  { %1087 = vperm.xlu0 %1398, %v1040_v40   ;;  %v1039_v25 = vmul.f32 0.5, %v1023_v23  ;;  %v1027_v20 = vadd.f32 1.0, %v1424_v19  ;;  %v959_v2 = vpop.xlane.xlu0 %958  ;;  %v1168_v40 = vadd.s32 4294967232, %v1903_v43  ;;  %v1150_v46 = vsub.s32 %v1147_v5, %v1643_v37 }
 0x36b   :  { %1075 = vperm.xlu1 %1397, %v1036_v39   ;;  %1427 = vtanh.f32 %v999_v9  ;;  %v1041_v56 = vmul.f32 0.5, %v1025_v30  ;;  %v984_v28 = vadd.f32 %v1884_v24, %v959_v2 }
 0x36c   :  { %v1043_v22 = vmul.f32 0.5, %v1027_v20  ;;  %1429 = vtanh.f32 %v998_v6  ;;  %v1171_v30 = vsub.s32 %v1168_v40, %v1643_v37 }
 0x36d   :  { %v1426_v50 = vpop.eup %1425  ;;  %v1000_v32 = vmul.f32 0.5, %v984_v28 }
 0x36e   :  { %1093 = vperm.xlu0 %1398, %v1042_v14   ;;  %v1029_v62 = vadd.f32 1.0, %v1426_v50  ;;  %v1175_v50 = vadd.s32 4294967224, %v1903_v43 }
 0x36f   :  { %1078 = vperm.xlu1 %1397, %v1037_v16  }
 0x370   :  { %v1045_v10 = vmul.f32 0.5, %v1029_v62 }
 0x373   :  { %1084 = vperm.xlu1 %1397, %v1039_v25   ;;  %v1182_v25 = vadd.s32 4294967216, %v1903_v43 }
 0x375   :  { %v1428_v54 = vpop.eup %1427  ;;  %v1185_v6 = vsub.s32 %v1182_v25, %v1643_v37 }
 0x376   :  { %v1031_v51 = vadd.f32 1.0, %v1428_v54  ;;  %v1430_v27 = vpop.eup %1429 }
 0x377   :  { %1090 = vperm.xlu1 %1397, %v1041_v56   ;;  %v1030_v4 = vadd.f32 1.0, %v1430_v27  ;;  %v1164_v56 = vsub.s32 %v1161_v13, %v1643_v37 }
 0x378   :  { %v1047_v52 = vmul.f32 0.5, %v1031_v51  ;;  %v1178_v51 = vsub.s32 %v1175_v50, %v1643_v37 }
 0x379   :  { %v1046_v44 = vmul.f32 0.5, %v1030_v4 }
 0x37b   :  { %1096 = vperm.xlu1 %1397, %v1043_v22   ;;  %v1189_v22 = vadd.s32 4294967208, %v1903_v43 }
 0x37d   :  { %v947_v26 = vpop.xlane.xlu1 %946 }
 0x37e   :  { %v980_v29 = vadd.f32 %v1884_v24, %v947_v26 }
 0x37f   :  { %1102 = vperm.xlu1 %1397, %v1045_v10  }
 0x380   :  { %v996_v31 = vmul.f32 0.5, %v980_v29  ;;  %v1196_v29 = vadd.s32 4294967200, %v1903_v43 }
 0x382   :  { %1431 = vtanh.f32 %v996_v31  ;;  %v1192_v31 = vsub.s32 %v1189_v22, %v1643_v37  ;;  %v1199_v4 = vsub.s32 %v1196_v29, %v1643_v37 }
 0x383   :  { %1108 = vperm.xlu1 %1397, %v1047_v52   ;;  %1433 = vtanh.f32 %v1000_v32  ;;  %v1203_v32 = vadd.s32 4294967192, %v1903_v43 }
 0x38c   :  { %v1432_v12 = vpop.eup %1431 }
 0x38d   :  { %v1028_v11 = vadd.f32 1.0, %v1432_v12  ;;  %v1434_v8 = vpop.eup %1433 }
 0x38e   :  { %v1032_v15 = vadd.f32 1.0, %v1434_v8 }
 0x38f   :  { %v1044_v38 = vmul.f32 0.5, %v1028_v11 }
 0x390   :  { %v1048_v24 = vmul.f32 0.5, %v1032_v15 }
 0x391   :  { %1099 = vperm.xlu0 %1398, %v1044_v38   ;;  %v1210_v38 = vadd.s32 4294967184, %v1903_v43 }
 0x395   :  { %1105 = vperm.xlu0 %1398, %v1046_v44  }
 0x399   :  { %1111 = vperm.xlu0 %1398, %v1048_v24   ;;  %v1206_v24 = vsub.s32 %v1203_v32, %v1643_v37 }
 0x3e1   :  { %v1067_v47 = vpop.permute.xlu0 %1066 }
 0x3e2   :  { %v1070_v33 = vpop.permute.xlu1 %1069  ;;  %v1118_v1 = vrot.slane %v1067_v47, %v1117_v53 }
 0x3e3   :  { %v1123_v0 = vrot.slane %v1070_v33, %v1122_v49  ;;  %v1217_v33 = vadd.s32 4294967176, %v1903_v43 }
 0x3e5   :  { %v1082_v18 = vpop.permute.xlu0 %1081  ;;  %v1125_v39 = vsel %vm1124_vm1, %v1123_v0, %v1118_v1  ;;  %v1220_v60 = vsub.s32 %v1217_v33, %v1643_v37 }
 0x3e6   :  { %v1073_v35 = vpop.permute.xlu1 %1072  ;;  %v1151_v20 = vrot.slane %v1082_v18, %v1150_v46 }
 0x3e7   :  { %v1130_v7 = vrot.slane %v1073_v35, %v1129_v55 }
 0x3e9   :  { %v1132_v14 = vsel %vm1131_vm2, %v1130_v7, %v1125_v39  ;;  %v1088_v23 = vpop.permute.xlu0 %1087 }
 0x3ea   :  { %v1076_v42 = vpop.permute.xlu1 %1075  ;;  %v1165_v26 = vrot.slane %v1088_v23, %v1164_v56 }
 0x3eb   :  { %v1137_v61 = vrot.slane %v1076_v42, %v1136_v48 }
 0x3ed   :  { %v1139_v16 = vsel %vm1138_vm3, %v1137_v61, %v1132_v14  ;;  %v1094_v28 = vpop.permute.xlu0 %1093 }
 0x3ee   :  { %v1079_v45 = vpop.permute.xlu1 %1078  ;;  %v1179_v12 = vrot.slane %v1094_v28, %v1178_v51 }
 0x3ef   :  { %v1144_v3 = vrot.slane %v1079_v45, %v1143_v57  ;;  %v1213_v45 = vsub.s32 %v1210_v38, %v1643_v37 }
 0x3f1   :  { %v1146_v17 = vsel %vm1145_vm4, %v1144_v3, %v1139_v16 }
 0x3f2   :  { %v1085_v59 = vpop.permute.xlu1 %1084  ;;  %v1153_v34 = vsel %vm1152_vm5, %v1151_v20, %v1146_v17 }
 0x3f3   :  { %v1158_v19 = vrot.slane %v1085_v59, %v1157_v41 }
 0x3f5   :  { %v1160_v54 = vsel %vm1159_vm6, %v1158_v19, %v1153_v34 }
 0x3f6   :  { %v1091_v9 = vpop.permute.xlu1 %1090  ;;  %v1167_v10 = vsel %vm1166_vm7, %v1165_v26, %v1160_v54 }
 0x3f7   :  { %v1172_v2 = vrot.slane %v1091_v9, %v1171_v30 }
 0x3f9   :  { %v1174_v52 = vsel %vm1173_vm8, %v1172_v2, %v1167_v10 }
 0x3fa   :  { %v1097_v62 = vpop.permute.xlu1 %1096  ;;  %v1181_v15 = vsel %vm1180_vm9, %v1179_v12, %v1174_v52 }
 0x3fb   :  { %v1186_v27 = vrot.slane %v1097_v62, %v1185_v6 }
 0x3fd   :  { %v1188_v35 = vsel %vm1187_vm10, %v1186_v27, %v1181_v15 }
 0x3fe   :  { %v1103_v11 = vpop.permute.xlu1 %1102 }
 0x3ff   :  { %v1200_v36 = vrot.slane %v1103_v11, %v1199_v4 }
 0x402   :  { %v1109_v58 = vpop.permute.xlu1 %1108 }
 0x403   :  { %v1214_v55 = vrot.slane %v1109_v58, %v1213_v45 }
 0x410   :  { %v1100_v8 = vpop.permute.xlu0 %1099 }
 0x411   :  { %v1193_v44 = vrot.slane %v1100_v8, %v1192_v31 }
 0x413   :  { %v1195_v42 = vsel %vm1194_vm11, %v1193_v44, %v1188_v35 }
 0x414   :  { %v1106_v21 = vpop.permute.xlu0 %1105  ;;  %v1202_v49 = vsel %vm1201_vm12, %v1200_v36, %v1195_v42 }
 0x415   :  { %v1207_v47 = vrot.slane %v1106_v21, %v1206_v24 }
 0x417   :  { %v1209_v53 = vsel %vm1208_vm13, %v1207_v47, %v1202_v49 }
 0x418   :  { %v1112_v48 = vpop.permute.xlu0 %1111  ;;  %v1216_v59 = vsel %vm1215_vm14, %v1214_v55, %v1209_v53 }
 0x419   :  { %v1221_v43 = vrot.slane %v1112_v48, %v1220_v60 }
 0x41b   :  { %v1223_v57 = vsel %vm1222_vm15, %v1221_v43, %v1216_v59 }
 0x41c   :  { %1225 = vst [vmem:[#allocation2] sm:$0x1] %v1223_v57 }
 0x41d   :  { %1446 = shalt.err (!%p1443_p4)
}
 0x41e   :  { %s1447_s17 = scalar_lea.hbm %s1951_s2, 16 }
 0x41f   :  { %p1448_p5 = scmp.ne.s32.totalorder %s1951_s2, %s1447_s17  ;;  %p1451_p6 = scmp.lt.u32.totalorder %s1447_s17, %s1951_s2 }
 0x421   :  { %p1453_p7 = pnand %p1451_p6, %p1448_p5 }
 0x423   :  { %1456 = shalt.err (!%p1453_p7)
}
 0x424   :  { %1235 = dma.vmem_to_hbm [thread:$0]  %s1233_s12, 16, %s1951_s2, [#allocation3]  }
 0x425   :  { %1457 = dma.done.wait [#allocation3], 16  }
 0x426   :  { %1458 = vsyncadd [#allocation3], 4294967280 }
 0x427   :  { %1239 = vsyncpa [#allocation3], 1 }

</bundles_post_ra>
